<compile_context>
chip_gen: v7x
topology: tpu7x:2x2x1
jax: 0.10.0
libtpu: 0.0.40
codegen_flags: <defaults>
</compile_context>

<pallas_src>
import jax
import jax.numpy as jnp
from jax.experimental import pallas as pl
from jax.experimental.pallas import tpu as pltpu


def _cdiv(a, b):
    return (a + b - 1) // b


def _round_up(n, m):
    return ((n + m - 1) // m) * m


def _vmem_limit_bytes():
    """~75% of physical VMEM: ~48 MiB on v7x, ~96 MiB on v5e/v6e."""
    try:
        cap = int(pltpu.get_tpu_info().vmem_capacity_bytes)
    except Exception:
        cap = 64 * 1024 * 1024          # conservative fallback (fits all gens)
    return max(16 * 1024 * 1024, (cap * 3) // 4)


def _pick_batch_tile(B, Kin, H, O, x_bytes, out_bytes, vmem_budget):
    """Largest 8-row-multiple batch tile that keeps the (double-buffered)
    resident weights plus the streamed x/out tiles and the live hidden
    activation under the VMEM budget, capped so the grid has >=2 steps."""
    # Constant-index blocks are still double-buffered by default.
    resident = 2 * (Kin * H * 2 + H * O * 2 + (H + O) * 4)
    if resident > vmem_budget:
        raise ValueError(
            "MLP weights do not fit VMEM-resident under the budget; add a "
            "K-reduction grid axis (see TODO at top of file).")
    # Per batch row: double-buffered streamed x / out tiles, the f32 hidden
    # activation, its bf16 downcast, and the bf16 copy of the x tile.
    per_row = 2 * (Kin * x_bytes + O * out_bytes) + H * (4 + 2) + Kin * 2
    tb = int((vmem_budget - resident) // per_row)
    tb = max(8, min(tb, 1024))
    if B > 8:
        # Keep >=2 grid steps so v7x can shard the "parallel" batch axis over
        # both TensorCores (neutral on v5e/v6e).
        tb = min(tb, max(8, _round_up(_cdiv(B, 2), 8)))
    tb = min(tb, _round_up(B, 8))
    return max(8, (tb // 8) * 8)


def mlp_kernel(x_ref, w1_ref, b1_ref, w2_ref, b2_ref, o_ref):
    # First linear: cast x to bf16 on-chip, MXU matmul with f32 accumulation.
    x = x_ref[...].astype(jnp.bfloat16)
    h = jnp.dot(x, w1_ref[...], preferred_element_type=jnp.float32)
    # Bias + ReLU on the VPU in f32.
    h = jnp.maximum(h + b1_ref[...], 0.0)
    # Second linear: downcast activations to bf16 for the MXU, f32 accumulate.
    y = jnp.dot(h.astype(w2_ref.dtype), w2_ref[...],
                preferred_element_type=jnp.float32)
    o_ref[...] = (y + b2_ref[...]).astype(o_ref.dtype)


def prepare_mlp_params(w1, b1, w2, b2):
    """One-time repack: bf16 weights for the MXU, f32 row-vector biases.
    Call once at init (NOT per forward step). Weights are stored
    (in_features, out_features), i.e. transposed vs. PyTorch's (out, in)."""
    return (jnp.asarray(w1, jnp.bfloat16),
            jnp.asarray(b1, jnp.float32).reshape(1, -1),
            jnp.asarray(w2, jnp.bfloat16),
            jnp.asarray(b2, jnp.float32).reshape(1, -1))


def mlp_forward(x, params):
    """y = relu(x @ w1 + b1) @ w2 + b2  (PyTorch Linear -> ReLU -> Linear)."""
    w1, b1, w2, b2 = params
    B, Kin = x.shape
    H = w1.shape[1]
    O = w2.shape[1]
    out_dtype = x.dtype
    x_bytes = jnp.dtype(x.dtype).itemsize
    out_bytes = jnp.dtype(out_dtype).itemsize

    vmem_limit = _vmem_limit_bytes()
    TB = _pick_batch_tile(B, Kin, H, O, x_bytes, out_bytes,
                          (vmem_limit * 7) // 8)
    grid = (_cdiv(B, TB),)

    flops = 2 * B * (Kin * H + H * O)
    bytes_accessed = (B * Kin * x_bytes + Kin * H * 2 + H * 4
                      + H * O * 2 + O * 4 + B * O * out_bytes)

    return pl.pallas_call(
        mlp_kernel,
        out_shape=jax.ShapeDtypeStruct((B, O), out_dtype),
        grid_spec=pl.GridSpec(
            grid=grid,
            in_specs=[
                pl.BlockSpec((TB, Kin), lambda i: (i, 0)),   # x: batch-streamed
                pl.BlockSpec((Kin, H), lambda i: (0, 0)),    # w1: VMEM-resident
                pl.BlockSpec((1, H), lambda i: (0, 0)),      # b1: VMEM-resident
                pl.BlockSpec((H, O), lambda i: (0, 0)),      # w2: VMEM-resident
                pl.BlockSpec((1, O), lambda i: (0, 0)),      # b2: VMEM-resident
            ],
            out_specs=pl.BlockSpec((TB, O), lambda i: (i, 0)),
        ),
        compiler_params=pltpu.CompilerParams(
            dimension_semantics=("parallel",),
            vmem_limit_bytes=vmem_limit,
        ),
        cost_estimate=pl.CostEstimate(
            flops=flops, transcendentals=0, bytes_accessed=bytes_accessed),
    )(x, w1, b1, w2, b2)


mlp_forward_jit = jax.jit(mlp_forward)


def init_linear_params(key, in_features, out_features, dtype=jnp.float32):
    # Mirrors PyTorch nn.Linear default init: U(-1/sqrt(fan_in), 1/sqrt(fan_in)).
    kw, kb = jax.random.split(key)
    bound = 1.0 / float(jnp.sqrt(jnp.array(in_features, jnp.float32)))
    # Stored as (in, out) == W.T relative to PyTorch's (out, in).
    w = jax.random.uniform(kw, (in_features, out_features), dtype,
                           minval=-bound, maxval=bound)
    b = jax.random.uniform(kb, (out_features,), dtype,
                           minval=-bound, maxval=bound)
    return w, b


if __name__ == "__main__":
    # MLPNetwork(input_dim=32, output_dim=16, hidden_size=128)
    input_dim, hidden_size, output_dim = 32, 128, 16

    key = jax.random.PRNGKey(0)
    k1, k2, kx = jax.random.split(key, 3)
    w1, b1 = init_linear_params(k1, input_dim, hidden_size)
    w2, b2 = init_linear_params(k2, hidden_size, output_dim)
    params = prepare_mlp_params(w1, b1, w2, b2)   # one-time repack

    # Pure-JAX reference with the same bf16-input / f32-accumulate recipe.
    w1b = w1.astype(jnp.bfloat16).astype(jnp.float32)
    w2b = w2.astype(jnp.bfloat16).astype(jnp.float32)

    # batches: multi-step grid (32), ragged last block (20), single block (8).
    for batch in (32, 20, 8):
        x = jax.random.normal(jax.random.fold_in(kx, batch),
                              (batch, input_dim), jnp.float32)
        out = jax.block_until_ready(mlp_forward_jit(x, params))

        xb = x.astype(jnp.bfloat16).astype(jnp.float32)
        h_ref = jnp.maximum(xb @ w1b + b1, 0.0)
        ref = h_ref.astype(jnp.bfloat16).astype(jnp.float32) @ w2b + b2

        assert out.shape == (batch, output_dim)
        assert out.dtype == x.dtype
        assert jnp.allclose(out, ref, atol=2e-2, rtol=2e-2), (
            batch, float(jnp.max(jnp.abs(out - ref))))

    print("KERNEL_OK")
</pallas_src>

<mosaic_0001>
module attributes {stable_mosaic.version = 11 : i64} {
  func.func @mlp_kernel(%arg0: i32, %arg1: memref<16x32xf32, #tpu.memory_space<vmem>>, %arg2: memref<32x128xbf16, #tpu.memory_space<vmem>>, %arg3: memref<1x128xf32, #tpu.memory_space<vmem>>, %arg4: memref<128x16xbf16, #tpu.memory_space<vmem>>, %arg5: memref<1x16xf32, #tpu.memory_space<vmem>>, %arg6: memref<16x16xf32, #tpu.memory_space<vmem>>) attributes {dimension_semantics = [#tpu.dimension_semantics<parallel>], iteration_bounds = array<i64: 2>, scalar_prefetch = 0 : i64, scratch_operands = 0 : i64, tpu.core_type = #tpu.core_type<tc>, window_params = [{transform_indices = @transform_0, window_bounds = array<i64: 16, 32>}, {pipeline_mode = #tpu.pipeline_mode<synchronous>, transform_indices = @transform_1, window_bounds = array<i64: 32, 128>}, {pipeline_mode = #tpu.pipeline_mode<synchronous>, transform_indices = @transform_2, window_bounds = array<i64: 1, 128>}, {pipeline_mode = #tpu.pipeline_mode<synchronous>, transform_indices = @transform_3, window_bounds = array<i64: 128, 16>}, {pipeline_mode = #tpu.pipeline_mode<synchronous>, transform_indices = @transform_4, window_bounds = array<i64: 1, 16>}, {transform_indices = @transform_5, window_bounds = array<i64: 16, 16>}]} {
    %c0 = arith.constant 0 : index
    %c0_0 = arith.constant 0 : index
    %0 = vector.load %arg1[%c0, %c0_0] : memref<16x32xf32, #tpu.memory_space<vmem>>, vector<16x32xf32>
    %1 = arith.truncf %0 : vector<16x32xf32> to vector<16x32xbf16>
    %c0_1 = arith.constant 0 : index
    %c0_2 = arith.constant 0 : index
    %2 = vector.load %arg2[%c0_1, %c0_2] : memref<32x128xbf16, #tpu.memory_space<vmem>>, vector<32x128xbf16>
    %cst = arith.constant dense<0.000000e+00> : vector<16x128xf32>
    %3 = tpu.matmul %1, %2, %cst {dimension_numbers = #tpu.dot_dimension_numbers<[1], [0], [0], [1], [0, 0, 1, 1], [], []>} : vector<16x32xbf16>, vector<32x128xbf16>, vector<16x128xf32> -> vector<16x128xf32>
    %c0_3 = arith.constant 0 : index
    %c0_4 = arith.constant 0 : index
    %4 = vector.load %arg3[%c0_3, %c0_4] : memref<1x128xf32, #tpu.memory_space<vmem>>, vector<1x128xf32>
    %5 = vector.broadcast %4 : vector<1x128xf32> to vector<16x128xf32>
    %6 = arith.addf %3, %5 : vector<16x128xf32>
    %cst_5 = arith.constant 0.000000e+00 : f32
    %7 = vector.broadcast %cst_5 : f32 to vector<16x128xf32>
    %8 = arith.maximumf %6, %7 : vector<16x128xf32>
    %9 = arith.truncf %8 : vector<16x128xf32> to vector<16x128xbf16>
    %c0_6 = arith.constant 0 : index
    %c0_7 = arith.constant 0 : index
    %10 = vector.load %arg4[%c0_6, %c0_7] : memref<128x16xbf16, #tpu.memory_space<vmem>>, vector<128x16xbf16>
    %cst_8 = arith.constant dense<0.000000e+00> : vector<16x16xf32>
    %11 = tpu.matmul %9, %10, %cst_8 {dimension_numbers = #tpu.dot_dimension_numbers<[1], [0], [0], [1], [0, 0, 1, 1], [], []>} : vector<16x128xbf16>, vector<128x16xbf16>, vector<16x16xf32> -> vector<16x16xf32>
    %c0_9 = arith.constant 0 : index
    %c0_10 = arith.constant 0 : index
    %12 = vector.load %arg5[%c0_9, %c0_10] : memref<1x16xf32, #tpu.memory_space<vmem>>, vector<1x16xf32>
    %13 = vector.broadcast %12 : vector<1x16xf32> to vector<16x16xf32>
    %14 = arith.addf %11, %13 : vector<16x16xf32>
    %c0_11 = arith.constant 0 : index
    %c0_12 = arith.constant 0 : index
    %15 = vector.load %arg6[%c0_11, %c0_12] : memref<16x16xf32, #tpu.memory_space<vmem>>, vector<16x16xf32>
    tpu.vector_store %arg6[%c0_11, %c0_12], %14 {strides = array<i32>} : memref<16x16xf32, #tpu.memory_space<vmem>>, vector<16x16xf32>,
    return
  }
  func.func @transform_0(%arg0: i32) -> (i32, i32) {
    %c0_i32 = arith.constant 0 : i32
    %c0_i32_0 = arith.constant 0 : i32
    return %arg0, %c0_i32 : i32, i32
  }
  func.func @transform_1(%arg0: i32) -> (i32, i32) {
    %c0_i32 = arith.constant 0 : i32
    %c0_i32_0 = arith.constant 0 : i32
    %c0_i32_1 = arith.constant 0 : i32
    return %c0_i32, %c0_i32_0 : i32, i32
  }
  func.func @transform_2(%arg0: i32) -> (i32, i32) {
    %c0_i32 = arith.constant 0 : i32
    %c0_i32_0 = arith.constant 0 : i32
    %c0_i32_1 = arith.constant 0 : i32
    return %c0_i32, %c0_i32_0 : i32, i32
  }
  func.func @transform_3(%arg0: i32) -> (i32, i32) {
    %c0_i32 = arith.constant 0 : i32
    %c0_i32_0 = arith.constant 0 : i32
    %c0_i32_1 = arith.constant 0 : i32
    return %c0_i32, %c0_i32_0 : i32, i32
  }
  func.func @transform_4(%arg0: i32) -> (i32, i32) {
    %c0_i32 = arith.constant 0 : i32
    %c0_i32_0 = arith.constant 0 : i32
    %c0_i32_1 = arith.constant 0 : i32
    return %c0_i32, %c0_i32_0 : i32, i32
  }
  func.func @transform_5(%arg0: i32) -> (i32, i32) {
    %c0_i32 = arith.constant 0 : i32
    %c0_i32_0 = arith.constant 0 : i32
    return %arg0, %c0_i32 : i32, i32
  }
}

</mosaic_0001>

<bundles_post_ra>
// kernel: mlp_forward.1
= control target key start
LH: loop header
LB: loop body
LE: loop exit
PB: predicated region body
PF: predicated region fallthrough
CT: control target
= control target key end

     0   :  { %s598_s18 = smov 0   ;;  %s658_s0 = inlined_call_operand.vmem [shape: f32[32,32], index: 0, kind: input, shape index: {}]   ;;  %s659_s1 = inlined_call_operand.vmem [shape: bf16[32,128], index: 1, kind: input, shape index: {}]   ;;  %s660_s2 = inlined_call_operand.vmem [shape: f32[1,128], index: 2, kind: input, shape index: {}]   ;;  %s661_s3 = inlined_call_operand.vmem [shape: bf16[128,16], index: 3, kind: input, shape index: {}]   ;;  %s662_s4 = inlined_call_operand.vmem [shape: f32[1,16], index: 4, kind: input, shape index: {}]   ;;  %s663_s5 = inlined_call_operand.vmem [shape: f32[32,16], index: 5, kind: output, shape index: {}]  }
   0x1 LB: > { %s474_s19 = sadd.s32 4294967295, %s564_s18   ;;  %p478_p0 = scmp.ge.s32.totalorder %s564_s18, 1  ;;  %s564_s18 = sphi %s598_s18, %s15_s18  }
   0x2   : > { %p188_p1 = scmp.lt.s32.totalorder %s564_s18, 3 }
   0x4   : > { %p189_p2 = pnand %p478_p0, %p188_p1 }
   0x5   : > { %v548_v0 = vld [vmem:[%s659_s1] sm:$0xff] (!%p189_p2)   ;;  %v566_v1 = vmov (!%p189_p2), 0.0   ;;  %v549_v2 = vld [vmem:[%s659_s1 + $0x8] sm:$0xff] (!%p189_p2)   ;;  %vm567_vm0 = vmmov (!%p189_p2), 0   ;;  %s479_s24 = sshll.u32 (!%p189_p2), %s474_s19, 1  ;;  %v552_v5 = vld [vmem:[%s661_s3 + $0x10] sm:$0xff] (!%p189_p2)  }
   0x6   : > { %192 = sbr.rel (%p189_p2) target bundleno = 456 (0x1c8), region = 40  ;;  %510 = vmatprep.subr.bf16.mxu0 (!%p189_p2), %v566_v1  ;;  %518 = vmatprep.subr.bf16.mxu1 (!%p189_p2), %v566_v1  ;;  %p217_p3 = scmp.lt.s32.totalorder (!%p189_p2), %s479_s24, 3  ;;  %v550_v3 = vld [vmem:[%s661_s3] sm:$0xff] (!%p189_p2)   ;;  %v551_v4 = vld [vmem:[%s661_s3 + $0x8] sm:$0xff] (!%p189_p2)   ;;  %vm255_vm1 = vcmask (!%p189_p2), 261120   ;;  %v553_v9 = vld [vmem:[%s661_s3 + $0x18] sm:$0xff] (!%p189_p2)  }
   0x7   : > { %511 = vmatpush3.bf16.msra.mxu0 (!%p189_p2), %v548_v0  ;;  %514 = vmatprep.mubr.msk.bf16.mxu0 (!%p189_p2), %vm567_vm0, %v566_v1  ;;  %v554_v10 = vld [vmem:[%s661_s3 + $0x20] sm:$0xff] (!%p189_p2)   ;;  %v555_v11 = vld [vmem:[%s661_s3 + $0x28] sm:$0xff] (!%p189_p2)   ;;  %v556_v12 = vld [vmem:[%s661_s3 + $0x30] sm:$0xff] (!%p189_p2)   ;;  %vm415_vm2 = vcmask (!%p189_p2), 130048  }
   0x8   : > { %512 = vmatprep.subr.bf16.mxu0 (!%p189_p2), %v566_v1  ;;  %534 = vmatprep.mubr.msk.bf16.mxu1 (!%p189_p2), %vm567_vm0, %v566_v1  ;;  %v557_v13 = vld [vmem:[%s661_s3 + $0x38] sm:$0xff] (!%p189_p2)   ;;  %v483_v14 = vld [vmem:[%s660_s2] ss:$0 sm:$0xff] (!%p189_p2) }
   0x9   : > { %519 = vmatpush3.bf16.msra.mxu1 (!%p189_p2), %v550_v3  ;;  %v487_v24 = vld [vmem:[%s662_s4] ss:$0 sm:$0xff] (!%p189_p2) }
   0xa   : > { %520 = vmatprep.subr.bf16.mxu1 (!%p189_p2), %v566_v1 }
   0xb   : > { %513 = vmatpush3.bf16.msra.mxu0 (!%p189_p2), %v549_v2 }
   0xd   : > { %s665_s24 = smov (!%p217_p3, %s479_s24), 3  ;;  %521 = vmatpush3.bf16.msra.mxu1 %v551_v4 }
   0xe   : > { %s480_s29 = sshll.u32 %s665_s24, 3  ;;  %522 = vmatprep.subr.bf16.mxu1 %v566_v1 }
   0xf   : > { %s220_s7 = scalar_lea.vmem %s658_s0, %s480_s29  ;;  %s226_s28 = scalar_lea.vmem %s663_s5, %s480_s29 }
  0x10   : > { %v229_v6 = vld [vmem:[%s220_s7] sm:$0xff]  ;;  %v230_v7 = vld [vmem:[%s220_s7 + $0x8] sm:$0xff] }
  0x11   : > { %v231_v8 = vpack.c.bf16 %v230_v7, %v229_v6  ;;  %523 = vmatpush3.bf16.msra.mxu1 %v552_v5 }
  0x12   : > { %524 = vmatprep.subr.bf16.mxu1 %v566_v1 }
  0x13   : > { %515 = vmatmul.mubr.msk.bf16.vlgmr.msra.gmra.mrb[0].mxu0 %vm255_vm1, %v231_v8 }
  0x15   : > { %525 = vmatpush3.bf16.msra.mxu1 %v553_v9 }
  0x16   : > { %526 = vmatprep.subr.bf16.mxu1 %v566_v1 }
  0x19   : > { %527 = vmatpush3.bf16.msra.mxu1 %v554_v10 }
  0x1a   : > { %528 = vmatprep.subr.bf16.mxu1 %v566_v1 }
  0x1d   : > { %529 = vmatpush3.bf16.msra.mxu1 %v555_v11 }
  0x1e   : > { %530 = vmatprep.subr.bf16.mxu1 %v566_v1 }
  0x21   : > { %531 = vmatpush3.bf16.msra.mxu1 %v556_v12 }
  0x22   : > { %532 = vmatprep.subr.bf16.mxu1 %v566_v1 }
  0x25   : > { %533 = vmatpush3.bf16.msra.mxu1 %v557_v13 }
  0xe6   : > { %v293_v15 = vpop.f32.mrb[0].mxu0 }
  0xe7   : > { %v294_v16 = vadd.f32 %v483_v14, %v293_v15  ;;  %v516_v17 = vpop.f32.mrb[1].mxu0 }
  0xe8   : > { %v296_v18 = vpop.f32.mrb[2].mxu0 }
  0xe9   : > { %v297_v19 = vadd.f32 %v483_v14, %v296_v18  ;;  %v517_v20 = vpop.f32.mrb[3].mxu0  ;;  %v300_v21 = vmax.f32 %v294_v16, 0.0 }
  0xeb   : > { %v301_v22 = vmax.f32 %v297_v19, 0.0 }
  0xed   : > { %v302_v23 = vpack.c.bf16 %v301_v22, %v300_v21 }
  0xef   : > { %535 = vmatmul.mubr.bf16.vlgmr.msra.gmra.mrb[0].mxu1 %v302_v23 }
 0x1c2   : > { %v408_v25 = vpop.f32.mrb[0].mxu1 }
 0x1c3   : > { %v409_v26 = vadd.f32 %v487_v24, %v408_v25  ;;  %v536_v27 = vpop.f32.mrb[1].mxu1 }
 0x1c4   : > { %v411_v28 = vpop.f32.mrb[2].mxu1 }
 0x1c5   : > { %416 = vst.msk [vmem:[%s226_s28] sm:$0xff] %vm415_vm2, %v409_v26  ;;  %v412_v29 = vadd.f32 %v487_v24, %v411_v28  ;;  %v537_v30 = vpop.f32.mrb[3].mxu1 }
 0x1c7   : > { %417 = vst.msk [vmem:[%s226_s28 + $0x8] sm:$0xff] %vm415_vm2, %v412_v29 }
 0x1c8 PF: > { %s15_s18 = sadd.s32 1, %s564_s18  }
 0x1c9   : > { %p12_p4 = scmp.ge.s32.totalorder %s15_s18, 4  }
 0x1cb   :  { %14 = sbr.rel (!%p12_p4) target bundleno = 1 (0x1), region = 70 }

</bundles_post_ra>
